<compile_context>
chip_gen: v6e
topology: v6e:2x2x1
jax: 0.10.0
libtpu: 0.0.40
codegen_flags: <defaults>
</compile_context>

<pallas_src>
import functools

import jax
import jax.numpy as jnp
from jax import lax
from jax.experimental import pallas as pl
from jax.experimental.pallas import tpu as pltpu

_LANES = 128
_MAX_BLOCK_ROWS = 2048  # f32: 1 MiB / input block; 3 inputs x 2 buffers = 6 MiB VMEM


def _oc_loss_kernel(pred_ref, pmask_ref, umask_ref, acc_ref, *,
                    use_bce: bool, focal_weight: float,
                    num_rows: int, block_rows: int, blocks_per_core: int):
    """Elementwise loss terms + per-core VPU accumulation into a (5, 8, 128) slab.

    acc_ref: (1, 5, 8, 128) f32 resident output block (per core-split slice):
      [0] positive_p_loss  [1] unlabeled_n_loss  [2] positive_n_loss
      [3] positive_mask    [4] unlabeled_mask
    """
    c = pl.program_id(0)   # core-split ("parallel") axis
    i = pl.program_id(1)   # sequential block axis

    @pl.when(i == 0)
    def _():
        acc_ref[...] = jnp.zeros_like(acc_ref)

    pred = pred_ref[...].astype(jnp.float32)
    pmask = pmask_ref[...].astype(jnp.float32)
    umask = umask_ref[...].astype(jnp.float32)

    # Rows not backed by real data (clipped boundary blocks, or fully-OOB logical
    # blocks whose index_map got clamped) must contribute exactly zero.
    start_row = (c * blocks_per_core + i) * block_rows
    row_ids = start_row + lax.broadcasted_iota(jnp.int32, pred.shape, 0)
    valid = row_ids < num_rows
    zero = jnp.float32(0.0)
    pred = jnp.where(valid, pred, zero)
    pmask = jnp.where(valid, pmask, zero)
    umask = jnp.where(valid, umask, zero)

    sig = jax.nn.sigmoid(pred)                              # single sigmoid, reused
    # p_weight = (1 - clamp(sigmoid(pred), 0, 0.999)) ** focal_weight
    base = 1.0 - jnp.clip(sig, 0.0, 0.999)                  # >= 0.001, log-safe
    p_weight = jnp.exp(jnp.float32(focal_weight) * jnp.log(base))

    if use_bce:
        eps = 1e-7
        p = jnp.clip(sig, eps, 1.0 - eps)
        pos_elem = -jnp.log(p)                              # bce_loss(pred, ., positive=True)
        neg_elem = -jnp.log(1.0 - p)                        # bce_loss(pred, ., positive=False)
    else:
        pos_elem = 1.0 - sig                                # sigmoid_loss(pred)  = sigmoid(-pred)
        neg_elem = sig                                      # sigmoid_loss(-pred) = sigmoid(pred)

    positive_p_loss = pos_elem * p_weight * pmask
    positive_n_loss = neg_elem * pmask
    unlabeled_n_loss = neg_elem * umask

    def fold(x):  # (block_rows, 128) -> (8, 128): vreg-wise VPU adds, no XLU
        return jnp.sum(x.reshape(-1, 8, _LANES), axis=0)

    acc_ref[0, 0] += fold(positive_p_loss)
    acc_ref[0, 1] += fold(unlabeled_n_loss)
    acc_ref[0, 2] += fold(positive_n_loss)
    acc_ref[0, 3] += fold(pmask)
    acc_ref[0, 4] += fold(umask)


def _round_up(x, m):
    return ((x + m - 1) // m) * m


def _sublane_multiple(*dtypes):
    mult = 8
    for dt in dtypes:
        isz = jnp.dtype(dt).itemsize
        if isz == 2:
            mult = max(mult, 16)
        elif isz <= 1:
            mult = max(mult, 32)
    return mult


def _to_rows(x, padded_total):
    flat = jnp.ravel(x)
    if flat.shape[0] != padded_total:   # only when total % 128 != 0 (rare)
        flat = jnp.pad(flat, (0, padded_total - flat.shape[0]))
    return flat.reshape(-1, _LANES)


@functools.partial(jax.jit,
                   static_argnames=("use_bce", "prior", "class_weight", "focal_weight"))
def _oc_loss_impl(pred, pmask, umask, *, use_bce, prior, class_weight, focal_weight):
    total = pred.size
    padded_total = _round_up(total, _LANES)
    num_rows = padded_total // _LANES
    sub = _sublane_multiple(pred.dtype, pmask.dtype, umask.dtype)
    block_rows = min(_MAX_BLOCK_ROWS, _round_up(num_rows, sub))
    nblocks = pl.cdiv(num_rows, block_rows)
    bpc = pl.cdiv(nblocks, 2)            # logical blocks per core-split slice

    pred2 = _to_rows(pred, padded_total)
    pmask2 = _to_rows(pmask, padded_total)   # native dtype; cast happens in-kernel
    umask2 = _to_rows(umask, padded_total)

    kernel = functools.partial(_oc_loss_kernel, use_bce=use_bce,
                               focal_weight=float(focal_weight),
                               num_rows=num_rows, block_rows=block_rows,
                               blocks_per_core=bpc)

    def in_map(c, i):
        # Clamp so fully-OOB logical blocks re-read a valid block (their contribution
        # is zeroed in-kernel via the row-validity mask).
        return (jnp.minimum(c * bpc + i, nblocks - 1), 0)

    partials = pl.pallas_call(
        kernel,
        out_shape=jax.ShapeDtypeStruct((2, 5, 8, _LANES), jnp.float32),
        grid_spec=pltpu.PrefetchScalarGridSpec(
            num_scalar_prefetch=0,
            grid=(2, bpc),
            in_specs=[pl.BlockSpec((block_rows, _LANES), in_map),
                      pl.BlockSpec((block_rows, _LANES), in_map),
                      pl.BlockSpec((block_rows, _LANES), in_map)],
            out_specs=pl.BlockSpec((1, 5, 8, _LANES), lambda c, i: (c, 0, 0, 0)),
        ),
        compiler_params=pltpu.CompilerParams(
            dimension_semantics=("parallel", "arbitrary")),
    )(pred2, pmask2, umask2)

    sums = jnp.sum(partials, axis=(0, 2, 3))   # single tiny final reduce -> (5,)
    s_pp, s_un, s_pn, s_pm, s_um = sums[0], sums[1], sums[2], sums[3], sums[4]

    prior_f = jnp.float32(prior)
    cw = jnp.float32(class_weight)
    estimated_p_loss = s_pp / s_pm
    estimated_u_n_loss = s_un / s_um
    estimated_p_n_loss = s_pn / s_pm
    estimated_n_loss = jnp.abs(estimated_u_n_loss - prior_f * estimated_p_n_loss) / (1.0 - prior_f)
    total_loss = cw * estimated_p_loss + (1.0 - cw) * estimated_n_loss
    return total_loss, estimated_p_loss, estimated_n_loss


def oc_loss_pf_forward(pred, positive_mask, unlabeled_mask, epoch, *,
                       prior=0.3, class_weight=0.3, focal_weight=0.1,
                       loss='sigmoid', warm_up_epoch=20):
    """JAX/Pallas port of OCLossPf.forward. Returns (loss, est_p_loss, est_n_loss)."""
    loss_mode = 'bce' if epoch < warm_up_epoch else loss
    if loss_mode not in ('bce', 'sigmoid'):
        raise NotImplementedError(loss_mode)
    use_bce = (loss_mode == 'bce')

    if pred.ndim == positive_mask.ndim + 1 and pred.shape[0] != 1:
        # N > 1: torch broadcasts the unsqueezed masks over batch; materialize once.
        positive_mask = jnp.broadcast_to(positive_mask[None], pred.shape)
        unlabeled_mask = jnp.broadcast_to(unlabeled_mask[None], pred.shape)

    return _oc_loss_impl(pred, positive_mask, unlabeled_mask, use_bce=use_bce,
                         prior=float(prior), class_weight=float(class_weight),
                         focal_weight=float(focal_weight))


def _reference(pred, positive_mask, unlabeled_mask, *, use_bce, prior, class_weight,
               focal_weight):
    """Pure-JAX reference implementing the same assumed loss forms."""
    pred = pred.astype(jnp.float32)
    pm = jnp.broadcast_to(positive_mask[None].astype(jnp.float32), pred.shape)
    um = jnp.broadcast_to(unlabeled_mask[None].astype(jnp.float32), pred.shape)
    sig = jax.nn.sigmoid(pred)
    p_weight = jnp.exp(focal_weight * jnp.log(1.0 - jnp.clip(sig, 0.0, 0.999)))
    if use_bce:
        eps = 1e-7
        p = jnp.clip(sig, eps, 1.0 - eps)
        pos_elem, neg_elem = -jnp.log(p), -jnp.log(1.0 - p)
    else:
        pos_elem, neg_elem = 1.0 - sig, sig
    ppl = pos_elem * pm * p_weight
    pnl = neg_elem * pm
    unl = neg_elem * um
    est_p = ppl.sum() / pm.sum()
    est_un = unl.sum() / um.sum()
    est_pn = pnl.sum() / pm.sum()
    est_n = jnp.abs(est_un - prior * est_pn) / (1.0 - prior)
    return class_weight * est_p + (1.0 - class_weight) * est_n, est_p, est_n


if __name__ == "__main__":
    key = jax.random.PRNGKey(0)
    k_pred, k_mask = jax.random.split(key)

    # Small deterministic inputs: pred [1, 4, 16, 16], masks [4, 16, 16].
    pred = jax.random.normal(k_pred, (1, 4, 16, 16), dtype=jnp.float32)
    positive_mask = (jax.random.uniform(k_mask, (4, 16, 16)) > 0.5).astype(jnp.float32)
    unlabeled_mask = 1.0 - positive_mask

    # epoch >= warm_up_epoch -> 'sigmoid' branch; epoch < warm_up_epoch -> 'bce' branch.
    out_sig = oc_loss_pf_forward(pred, positive_mask, unlabeled_mask, epoch=25)
    out_bce = oc_loss_pf_forward(pred, positive_mask, unlabeled_mask, epoch=5)
    jax.block_until_ready(out_sig)
    jax.block_until_ready(out_bce)

    # Light correctness check against the pure-JAX reference.
    ref_sig = _reference(pred, positive_mask, unlabeled_mask, use_bce=False,
                         prior=0.3, class_weight=0.3, focal_weight=0.1)
    ref_bce = _reference(pred, positive_mask, unlabeled_mask, use_bce=True,
                         prior=0.3, class_weight=0.3, focal_weight=0.1)
    for got, want in zip(out_sig + out_bce, ref_sig + ref_bce):
        assert abs(float(got) - float(want)) <= 1e-3 * (1.0 + abs(float(want))), (
            float(got), float(want))

    print("KERNEL_OK")
</pallas_src>

<mosaic_0001>
module attributes {stable_mosaic.version = 11 : i64} {
  func.func @_oc_loss_kernel(%arg0: i32, %arg1: i32, %arg2: memref<8x128xf32, #tpu.memory_space<vmem>>, %arg3: memref<8x128xf32, #tpu.memory_space<vmem>>, %arg4: memref<8x128xf32, #tpu.memory_space<vmem>>, %arg5: memref<1x5x8x128xf32, #tpu.memory_space<vmem>>) attributes {dimension_semantics = [#tpu.dimension_semantics<parallel>, #tpu.dimension_semantics<arbitrary>], iteration_bounds = array<i64: 2, 1>, scalar_prefetch = 0 : i64, scratch_operands = 0 : i64, tpu.core_type = #tpu.core_type<tc>, window_params = [{transform_indices = @transform_0, window_bounds = array<i64: 8, 128>}, {transform_indices = @transform_1, window_bounds = array<i64: 8, 128>}, {transform_indices = @transform_2, window_bounds = array<i64: 8, 128>}, {transform_indices = @transform_3, window_bounds = array<i64: 1, 5, 8, 128>}]} {
    %c0_i32 = arith.constant 0 : i32
    %0 = arith.cmpi eq, %arg1, %c0_i32 : i32
    %1 = arith.extui %0 : i1 to i32
    %c0_i32_0 = arith.constant 0 : i32
    %2 = arith.cmpi ne, %1, %c0_i32_0 : i32
    scf.if %2 {
      %cst_56 = arith.constant 0.000000e+00 : f32
      %81 = vector.broadcast %cst_56 : f32 to vector<1x5x8x128xf32>
      %c0_57 = arith.constant 0 : index
      %c0_58 = arith.constant 0 : index
      %c0_59 = arith.constant 0 : index
      %c0_60 = arith.constant 0 : index
      %82 = vector.load %arg5[%c0_57, %c0_58, %c0_59, %c0_60] : memref<1x5x8x128xf32, #tpu.memory_space<vmem>>, vector<1x5x8x128xf32>
      tpu.vector_store %arg5[%c0_57, %c0_58, %c0_59, %c0_60], %81 {strides = array<i32>} : memref<1x5x8x128xf32, #tpu.memory_space<vmem>>, vector<1x5x8x128xf32>,
    } else {
    }
    %c0 = arith.constant 0 : index
    %c0_1 = arith.constant 0 : index
    %3 = vector.load %arg2[%c0, %c0_1] : memref<8x128xf32, #tpu.memory_space<vmem>>, vector<8x128xf32>
    %c0_2 = arith.constant 0 : index
    %c0_3 = arith.constant 0 : index
    %4 = vector.load %arg3[%c0_2, %c0_3] : memref<8x128xf32, #tpu.memory_space<vmem>>, vector<8x128xf32>
    %c0_4 = arith.constant 0 : index
    %c0_5 = arith.constant 0 : index
    %5 = vector.load %arg4[%c0_4, %c0_5] : memref<8x128xf32, #tpu.memory_space<vmem>>, vector<8x128xf32>
    %c1_i32 = arith.constant 1 : i32
    %6 = arith.muli %arg0, %c1_i32 : i32
    %7 = arith.addi %6, %arg1 : i32
    %c8_i32 = arith.constant 8 : i32
    %8 = arith.muli %7, %c8_i32 : i32
    %9 = tpu.iota {dimensions = array<i32: 0>} : vector<8x128xi32>
    %10 = vector.broadcast %8 : i32 to vector<8x128xi32>
    %11 = arith.addi %10, %9 : vector<8x128xi32>
    %c8_i32_6 = arith.constant 8 : i32
    %12 = vector.broadcast %c8_i32_6 : i32 to vector<8x128xi32>
    %13 = arith.cmpi slt, %11, %12 : vector<8x128xi32>
    %cst = arith.constant 0.000000e+00 : f32
    %14 = vector.broadcast %cst : f32 to vector<8x128xf32>
    %15 = arith.select %13, %3, %14 : vector<8x128xi1>, vector<8x128xf32>
    %cst_7 = arith.constant 0.000000e+00 : f32
    %16 = vector.broadcast %cst_7 : f32 to vector<8x128xf32>
    %17 = arith.select %13, %4, %16 : vector<8x128xi1>, vector<8x128xf32>
    %cst_8 = arith.constant 0.000000e+00 : f32
    %18 = vector.broadcast %cst_8 : f32 to vector<8x128xf32>
    %19 = arith.select %13, %5, %18 : vector<8x128xi1>, vector<8x128xf32>
    %20 = arith.negf %15 : vector<8x128xf32>
    %21 = math.exp %20 : vector<8x128xf32>
    %cst_9 = arith.constant 1.000000e+00 : f32
    %22 = vector.broadcast %cst_9 : f32 to vector<8x128xf32>
    %23 = arith.addf %22, %21 : vector<8x128xf32>
    %24 = arith.divf %22, %23 : vector<8x128xf32>
    %cst_10 = arith.constant 0.000000e+00 : f32
    %cst_11 = arith.constant 9.990000e-01 : f32
    %25 = vector.broadcast %cst_10 : f32 to vector<8x128xf32>
    %26 = arith.maximumf %25, %24 : vector<8x128xf32>
    %27 = vector.broadcast %cst_11 : f32 to vector<8x128xf32>
    %28 = arith.minimumf %27, %26 : vector<8x128xf32>
    %cst_12 = arith.constant 1.000000e+00 : f32
    %29 = vector.broadcast %cst_12 : f32 to vector<8x128xf32>
    %30 = arith.subf %29, %28 : vector<8x128xf32>
    %31 = math.log %30 : vector<8x128xf32>
    %cst_13 = arith.constant 1.000000e-01 : f32
    %32 = vector.broadcast %cst_13 : f32 to vector<8x128xf32>
    %33 = arith.mulf %32, %31 : vector<8x128xf32>
    %34 = math.exp %33 : vector<8x128xf32>
    %cst_14 = arith.constant 1.000000e+00 : f32
    %35 = vector.broadcast %cst_14 : f32 to vector<8x128xf32>
    %36 = arith.subf %35, %24 : vector<8x128xf32>
    %37 = arith.mulf %36, %34 : vector<8x128xf32>
    %38 = arith.mulf %37, %17 : vector<8x128xf32>
    %39 = arith.mulf %24, %17 : vector<8x128xf32>
    %40 = arith.mulf %24, %19 : vector<8x128xf32>
    %c0_15 = arith.constant 0 : index
    %c0_16 = arith.constant 0 : index
    %c0_17 = arith.constant 0 : index
    %c0_18 = arith.constant 0 : index
    %41 = vector.load %arg5[%c0_15, %c0_16, %c0_17, %c0_18] : memref<1x5x8x128xf32, #tpu.memory_space<vmem>>, vector<1x1x8x128xf32>
    %42 = vector.shape_cast %41 : vector<1x1x8x128xf32> to vector<8x128xf32>
    %43 = vector.shape_cast %38 : vector<8x128xf32> to vector<1x8x128xf32>
    %cst_19 = arith.constant dense<0.000000e+00> : vector<8x128xf32>
    %44 = vector.multi_reduction <add>, %43, %cst_19 [0] : vector<1x8x128xf32> to vector<8x128xf32>
    %45 = arith.addf %42, %44 : vector<8x128xf32>
    %c0_20 = arith.constant 0 : index
    %c0_21 = arith.constant 0 : index
    %c0_22 = arith.constant 0 : index
    %c0_23 = arith.constant 0 : index
    %46 = vector.load %arg5[%c0_20, %c0_21, %c0_22, %c0_23] : memref<1x5x8x128xf32, #tpu.memory_space<vmem>>, vector<1x1x8x128xf32>
    %47 = vector.shape_cast %46 : vector<1x1x8x128xf32> to vector<8x128xf32>
    %48 = vector.shape_cast %45 : vector<8x128xf32> to vector<1x1x8x128xf32>
    tpu.vector_store %arg5[%c0_20, %c0_21, %c0_22, %c0_23], %48 {strides = array<i32>} : memref<1x5x8x128xf32, #tpu.memory_space<vmem>>, vector<1x1x8x128xf32>,
    %c0_24 = arith.constant 0 : index
    %c1 = arith.constant 1 : index
    %c0_25 = arith.constant 0 : index
    %c0_26 = arith.constant 0 : index
    %49 = vector.load %arg5[%c0_24, %c1, %c0_25, %c0_26] : memref<1x5x8x128xf32, #tpu.memory_space<vmem>>, vector<1x1x8x128xf32>
    %50 = vector.shape_cast %49 : vector<1x1x8x128xf32> to vector<8x128xf32>
    %51 = vector.shape_cast %40 : vector<8x128xf32> to vector<1x8x128xf32>
    %cst_27 = arith.constant dense<0.000000e+00> : vector<8x128xf32>
    %52 = vector.multi_reduction <add>, %51, %cst_27 [0] : vector<1x8x128xf32> to vector<8x128xf32>
    %53 = arith.addf %50, %52 : vector<8x128xf32>
    %c0_28 = arith.constant 0 : index
    %c1_29 = arith.constant 1 : index
    %c0_30 = arith.constant 0 : index
    %c0_31 = arith.constant 0 : index
    %54 = vector.load %arg5[%c0_28, %c1_29, %c0_30, %c0_31] : memref<1x5x8x128xf32, #tpu.memory_space<vmem>>, vector<1x1x8x128xf32>
    %55 = vector.shape_cast %54 : vector<1x1x8x128xf32> to vector<8x128xf32>
    %56 = vector.shape_cast %53 : vector<8x128xf32> to vector<1x1x8x128xf32>
    tpu.vector_store %arg5[%c0_28, %c1_29, %c0_30, %c0_31], %56 {strides = array<i32>} : memref<1x5x8x128xf32, #tpu.memory_space<vmem>>, vector<1x1x8x128xf32>,
    %c0_32 = arith.constant 0 : index
    %c2 = arith.constant 2 : index
    %c0_33 = arith.constant 0 : index
    %c0_34 = arith.constant 0 : index
    %57 = vector.load %arg5[%c0_32, %c2, %c0_33, %c0_34] : memref<1x5x8x128xf32, #tpu.memory_space<vmem>>, vector<1x1x8x128xf32>
    %58 = vector.shape_cast %57 : vector<1x1x8x128xf32> to vector<8x128xf32>
    %59 = vector.shape_cast %39 : vector<8x128xf32> to vector<1x8x128xf32>
    %cst_35 = arith.constant dense<0.000000e+00> : vector<8x128xf32>
    %60 = vector.multi_reduction <add>, %59, %cst_35 [0] : vector<1x8x128xf32> to vector<8x128xf32>
    %61 = arith.addf %58, %60 : vector<8x128xf32>
    %c0_36 = arith.constant 0 : index
    %c2_37 = arith.constant 2 : index
    %c0_38 = arith.constant 0 : index
    %c0_39 = arith.constant 0 : index
    %62 = vector.load %arg5[%c0_36, %c2_37, %c0_38, %c0_39] : memref<1x5x8x128xf32, #tpu.memory_space<vmem>>, vector<1x1x8x128xf32>
    %63 = vector.shape_cast %62 : vector<1x1x8x128xf32> to vector<8x128xf32>
    %64 = vector.shape_cast %61 : vector<8x128xf32> to vector<1x1x8x128xf32>
    tpu.vector_store %arg5[%c0_36, %c2_37, %c0_38, %c0_39], %64 {strides = array<i32>} : memref<1x5x8x128xf32, #tpu.memory_space<vmem>>, vector<1x1x8x128xf32>,
    %c0_40 = arith.constant 0 : index
    %c3 = arith.constant 3 : index
    %c0_41 = arith.constant 0 : index
    %c0_42 = arith.constant 0 : index
    %65 = vector.load %arg5[%c0_40, %c3, %c0_41, %c0_42] : memref<1x5x8x128xf32, #tpu.memory_space<vmem>>, vector<1x1x8x128xf32>
    %66 = vector.shape_cast %65 : vector<1x1x8x128xf32> to vector<8x128xf32>
    %67 = vector.shape_cast %17 : vector<8x128xf32> to vector<1x8x128xf32>
    %cst_43 = arith.constant dense<0.000000e+00> : vector<8x128xf32>
    %68 = vector.multi_reduction <add>, %67, %cst_43 [0] : vector<1x8x128xf32> to vector<8x128xf32>
    %69 = arith.addf %66, %68 : vector<8x128xf32>
    %c0_44 = arith.constant 0 : index
    %c3_45 = arith.constant 3 : index
    %c0_46 = arith.constant 0 : index
    %c0_47 = arith.constant 0 : index
    %70 = vector.load %arg5[%c0_44, %c3_45, %c0_46, %c0_47] : memref<1x5x8x128xf32, #tpu.memory_space<vmem>>, vector<1x1x8x128xf32>
    %71 = vector.shape_cast %70 : vector<1x1x8x128xf32> to vector<8x128xf32>
    %72 = vector.shape_cast %69 : vector<8x128xf32> to vector<1x1x8x128xf32>
    tpu.vector_store %arg5[%c0_44, %c3_45, %c0_46, %c0_47], %72 {strides = array<i32>} : memref<1x5x8x128xf32, #tpu.memory_space<vmem>>, vector<1x1x8x128xf32>,
    %c0_48 = arith.constant 0 : index
    %c4 = arith.constant 4 : index
    %c0_49 = arith.constant 0 : index
    %c0_50 = arith.constant 0 : index
    %73 = vector.load %arg5[%c0_48, %c4, %c0_49, %c0_50] : memref<1x5x8x128xf32, #tpu.memory_space<vmem>>, vector<1x1x8x128xf32>
    %74 = vector.shape_cast %73 : vector<1x1x8x128xf32> to vector<8x128xf32>
    %75 = vector.shape_cast %19 : vector<8x128xf32> to vector<1x8x128xf32>
    %cst_51 = arith.constant dense<0.000000e+00> : vector<8x128xf32>
    %76 = vector.multi_reduction <add>, %75, %cst_51 [0] : vector<1x8x128xf32> to vector<8x128xf32>
    %77 = arith.addf %74, %76 : vector<8x128xf32>
    %c0_52 = arith.constant 0 : index
    %c4_53 = arith.constant 4 : index
    %c0_54 = arith.constant 0 : index
    %c0_55 = arith.constant 0 : index
    %78 = vector.load %arg5[%c0_52, %c4_53, %c0_54, %c0_55] : memref<1x5x8x128xf32, #tpu.memory_space<vmem>>, vector<1x1x8x128xf32>
    %79 = vector.shape_cast %78 : vector<1x1x8x128xf32> to vector<8x128xf32>
    %80 = vector.shape_cast %77 : vector<8x128xf32> to vector<1x1x8x128xf32>
    tpu.vector_store %arg5[%c0_52, %c4_53, %c0_54, %c0_55], %80 {strides = array<i32>} : memref<1x5x8x128xf32, #tpu.memory_space<vmem>>, vector<1x1x8x128xf32>,
    return
  }
  func.func @transform_0(%arg0: i32, %arg1: i32) -> (i32, i32) {
    %c1_i32 = arith.constant 1 : i32
    %0 = arith.muli %arg0, %c1_i32 : i32
    %1 = arith.addi %0, %arg1 : i32
    %c0_i32 = arith.constant 0 : i32
    %2 = arith.minsi %1, %c0_i32 : i32
    %c0_i32_0 = arith.constant 0 : i32
    %c0_i32_1 = arith.constant 0 : i32
    return %2, %c0_i32_0 : i32, i32
  }
  func.func @transform_1(%arg0: i32, %arg1: i32) -> (i32, i32) {
    %c1_i32 = arith.constant 1 : i32
    %0 = arith.muli %arg0, %c1_i32 : i32
    %1 = arith.addi %0, %arg1 : i32
    %c0_i32 = arith.constant 0 : i32
    %2 = arith.minsi %1, %c0_i32 : i32
    %c0_i32_0 = arith.constant 0 : i32
    %c0_i32_1 = arith.constant 0 : i32
    return %2, %c0_i32_0 : i32, i32
  }
  func.func @transform_2(%arg0: i32, %arg1: i32) -> (i32, i32) {
    %c1_i32 = arith.constant 1 : i32
    %0 = arith.muli %arg0, %c1_i32 : i32
    %1 = arith.addi %0, %arg1 : i32
    %c0_i32 = arith.constant 0 : i32
    %2 = arith.minsi %1, %c0_i32 : i32
    %c0_i32_0 = arith.constant 0 : i32
    %c0_i32_1 = arith.constant 0 : i32
    return %2, %c0_i32_0 : i32, i32
  }
  func.func @transform_3(%arg0: i32, %arg1: i32) -> (i32, i32, i32, i32) {
    %c0_i32 = arith.constant 0 : i32
    %c0_i32_0 = arith.constant 0 : i32
    %c0_i32_1 = arith.constant 0 : i32
    %c0_i32_2 = arith.constant 0 : i32
    return %arg0, %c0_i32, %c0_i32_0, %c0_i32_1 : i32, i32, i32, i32
  }
}

</mosaic_0001>

<bundles_post_ra>
// kernel: _oc_loss_impl.1
= control target key start
LH: loop header
LB: loop body
LE: loop exit
PB: predicated region body
PF: predicated region fallthrough
CT: control target
= control target key end

     0   :  { %s537_s12 = smov 0   ;;  %s539_s13 = smov 0   ;;  %s576_s0 = inlined_call_operand.vmem [shape: f32[8,128], index: 0, kind: input, shape index: {}]   ;;  %s577_s1 = inlined_call_operand.vmem [shape: f32[8,128], index: 1, kind: input, shape index: {}]   ;;  %s578_s2 = inlined_call_operand.vmem [shape: f32[8,128], index: 2, kind: input, shape index: {}]   ;;  %s579_s3 = inlined_call_operand.vmem [shape: f32[2,5,8,128], index: 3, kind: output, shape index: {}]  }
   0x1   :  { %s541_s14 = smov 0  }
   0x2 LB: > { %s25_s15 = sadd.s32 1, %s511_s13  ;;  %p433_p0 = scmp.ge.s32.totalorder %s515_s14, 1  ;;  %s515_s14 = sphi %s541_s14, %s13_s14   ;;  %s511_s13 = sphi %s539_s13, %s581_s13   ;;  %s507_s12 = sphi %s537_s12, %s580_s12  }
   0x3   : > { %p27_p1 = scmp.ge.s32.totalorder %s25_s15, 2  ;;  %p202_p2 = scmp.lt.s32.totalorder %s515_s14, 3 }
   0x5   : > { %s583_s15 = smov (%p27_p1, %s25_s15), 0  ;;  %p203_p3 = pnand %p433_p0, %p202_p2 }
   0x6   : > { %p272_p4 = scmp.lt.s32.totalorder (!%p203_p3), %s507_s12, 1  ;;  %p243_p5 = scmp.lt.s32.totalorder (!%p203_p3), %s507_s12, 0 }
   0x7   : > { %206 = sbr.rel (%p203_p3) target bundleno = 97 (0x61), region = 32  ;;  %s447_s16 = sshll.u32 (!%p203_p3), %s507_s12, 3 }
   0xc   : > { %v291_v0 = vlaneseq  ;;  %s273_s17 = scalar_select %p272_p4, %s507_s12, 1  ;;  %v293_v2 = vstv %s447_s16 }
   0xd   : > { %s585_s12 = smov (!%p243_p5, %s507_s12), 0 }
   0xe   : > { %v292_v1 = vshrl.u32 %v291_v0, 7  ;;  %s587_s12 = smov (!%p243_p5, %s585_s12), 0  ;;  %s459_s18 = smul.u32 40, %s273_s17 }
   0xf   : > { %s437_s19 = sshll.u32 %s587_s12, 3 }
  0x10   : > { %v294_v3 = vadd.s32 %v293_v2, %v292_v1  ;;  %s248_s22 = scalar_lea.vmem %s576_s0, %s437_s19  ;;  %s258_s25 = scalar_lea.vmem %s577_s1, %s437_s19 }
  0x11   : > { %v286_v4 = vld [vmem:[%s248_s22] sm:$0xff]  ;;  %s268_s28 = scalar_lea.vmem %s578_s2, %s437_s19  ;;  %s276_s4 = scalar_lea.vmem %s579_s3, %s459_s18 }
  0x12   : > { %vm295_vm0 = vcmp.lt.s32.totalorder %v294_v3, 8  ;;  %v287_v5 = vld [vmem:[%s258_s25] sm:$0xff] }
  0x13   : > { %v296_v6 = vsel %vm295_vm0, %v286_v4, 0.0  ;;  %v297_v7 = vsel %vm295_vm0, %v287_v5, 0.0  ;;  %v288_v8 = vld [vmem:[%s268_s28] sm:$0xff] }
  0x14   : > { %v448_v9 = vmul.f32 -1.442695, %v296_v6  ;;  %v298_v10 = vsel %vm295_vm0, %v288_v8, 0.0  ;;  %454 = vst [vmem:[%s276_s4 + $0x18] sm:$0xff] %v297_v7 }
  0x15   : > { %456 = vst [vmem:[%s276_s4 + $0x20] sm:$0xff] %v298_v10 }
  0x16   : > { %485 = vpow2.f32 %v448_v9 }
  0x23   : > { %v486_v11 = vpop.eup %485 }
  0x24   : > { %v302_v12 = vadd.f32 1.0, %v486_v11 }
  0x26   : > { %487 = vrcp.f32 %v302_v12 }
  0x33   : > { %v488_v13 = vpop.eup %487 }
  0x34   : > { %v305_v14 = vmax.f32 %v488_v13, 0.0  ;;  %v317_v15 = vmul.f32 %v488_v13, %v298_v10  ;;  %v316_v16 = vmul.f32 %v488_v13, %v297_v7  ;;  %v313_v23 = vsub.f32 1.0, %v488_v13 }
  0x36   : > { %v306_v17 = vmin.f32 %v305_v14, 0.999  ;;  %450 = vst [vmem:[%s276_s4 + $0x8] sm:$0xff] %v317_v15  ;;  %452 = vst [vmem:[%s276_s4 + $0x10] sm:$0xff] %v316_v16 }
  0x38   : > { %v307_v18 = vsub.f32 1.0, %v306_v17 }
  0x3a   : > { %489 = vlog2.f32 %v307_v18 }
  0x47   : > { %v490_v19 = vpop.eup %489 }
  0x48   : > { %v309_v20 = vmul.f32 0.6931472, %v490_v19 }
  0x4a   : > { %v310_v21 = vmul.f32 0.1, %v309_v20 }
  0x4c   : > { %v311_v22 = vmul.f32 1.442695, %v310_v21 }
  0x4e   : > { %491 = vpow2.f32 %v311_v22 }
  0x5b   : > { %v492_v24 = vpop.eup %491 }
  0x5c   : > { %v314_v25 = vmul.f32 %v492_v24, %v313_v23 }
  0x5e   : > { %v315_v26 = vmul.f32 %v314_v25, %v297_v7 }
  0x60   : > { %321 = vst [vmem:[%s276_s4] sm:$0xff] %v315_v26 }
  0x61 PF: > { %s13_s14 = sadd.s32 1, %s515_s14   ;;  %s580_s12 = smov %s511_s13 }
  0x62   : > { %p10_p6 = scmp.ge.s32.totalorder %s13_s14, 4   ;;  %s581_s13 = smov %s583_s15 }
  0x64   :  { %12 = sbr.rel (!%p10_p6) target bundleno = 2 (0x2), region = 76 }

</bundles_post_ra>
